<compile_context>
chip_gen: v7x
topology: tpu7x:2x2x1
jax: 0.10.0
libtpu: 0.0.40
codegen_flags: <defaults>
</compile_context>

<pallas_src>
import math
import jax
import jax.numpy as jnp
from jax.experimental import pallas as pl
from jax.experimental.pallas import tpu as pltpu


def _nqa_kernel(kf_ref, qxT_ref, wk_ref, bk_ref, wp_ref, bp_ref, out_ref, score_ref):
    R, E = kf_ref.shape            # R = BB * L
    H, Q = qxT_ref.shape
    OUT = out_ref.shape[1]
    L = score_ref.shape[1]
    BB = R // L

    # --- kx for all BB batches: one MXU-shaped matmul --------------------------
    kx = jnp.dot(kf_ref[...], wk_ref[...],
                 preferred_element_type=jnp.float32) + bk_ref[...]      # (BB*L, H) f32

    # --- score logits: one flat matmul against batch-invariant qx^T ------------
    s = jnp.dot(kx.astype(qxT_ref.dtype), qxT_ref[...],
                preferred_element_type=jnp.float32)                     # (BB*L, Q)
    s3 = s.reshape(BB, L, Q)                                            # leading-dim split

    # --- softmax over k_len (axis=1) --------------------------------------------
    s3 = s3 - jnp.max(s3, axis=1, keepdims=True)
    p3 = jnp.exp(s3)
    p3 = p3 * pl.reciprocal(jnp.sum(p3, axis=1, keepdims=True), approx=False)  # (BB,L,Q)

    # --- context ----------------------------------------------------------------
    kx3 = kx.reshape(BB, L, H)
    if Q == 1:
        # VPU broadcast-multiply + sublane reduce; MXU stays free.
        ctx = jnp.sum(p3 * kx3, axis=1)                                 # (BB, H) == (BB*Q, H)
    else:
        ctx = jax.lax.dot_general(
            p3, kx3,
            dimension_numbers=(((1,), (1,)), ((0,), (0,))),
            preferred_element_type=jnp.float32).reshape(BB * Q, H)      # (BB*Q, H)

    # --- output projection --------------------------------------------------------
    out = jnp.dot(ctx.astype(wp_ref.dtype), wp_ref[...],
                  preferred_element_type=jnp.float32) + bp_ref[...]     # (BB*Q, OUT)

    out_ref[...] = out.astype(out_ref.dtype)
    # lane-dense score slab: (BB, L, Q) -> (BB, Q, L) -> (BB*Q, L); tiny XLU shuffle.
    score_ref[...] = jnp.swapaxes(p3, 1, 2).reshape(BB * Q, L).astype(score_ref.dtype)


def _round_up(x, m):
    return ((x + m - 1) // m) * m


def _vmem_capacity_bytes():
    try:
        cap = int(getattr(pltpu.get_tpu_info(), "vmem_capacity_bytes"))
        if cap > 0:
            return cap
    except Exception:
        pass
    return 64 * 1024 * 1024          # conservative: v7x per-TensorCore VMEM


def _pick_block_batch(B, L, E, H, Q, OUT, budget_bytes):
    """Pick how many batches to fuse per grid step (targets ~1024 k rows/step)."""
    per_b = 4 * (2 * L * E + L * H + 4 * L * Q + 2 * Q * (OUT + L)) + 64
    bb_fit = max(1, budget_bytes // per_b)
    bb_rows = max(1, pl.cdiv(1024, max(L, 1)))
    bb = min(int(bb_fit), int(bb_rows), B)
    if B >= 16:
        # Keep >= 2 grid steps so the "parallel" batch axis can shard across both
        # v7x TensorCores (also helps pipelining on v5e/v6e).
        bb = min(bb, _round_up(pl.cdiv(B, 2), 8))
    if bb >= B:
        return B, 1                       # single step: blocks equal the full dims
    bb = max(8, (bb // 8) * 8)            # multi-step blocks must be sublane-aligned
    return bb, pl.cdiv(B, bb)


def no_query_attention(k, q_param, wk_t, bk, wq_t, bq, wp_t, bp, *, block_batch=None):
    """k: (B, L, E). Weights pre-transposed: wk_t (E,H), wq_t (E,H), wp_t (H,OUT).
    Returns (output (B, Q, OUT), score (B, Q, L))."""
    B, L, E = k.shape
    Q = q_param.shape[0]
    H = wk_t.shape[1]
    OUT = wp_t.shape[1]

    # Batch-invariant query projection, hoisted out of the kernel and pre-transposed.
    qx = (jnp.dot(q_param.astype(jnp.float32), wq_t.astype(jnp.float32),
                  preferred_element_type=jnp.float32)
          + bq.reshape(1, H).astype(jnp.float32))                       # (Q, H)

    cdtype = jnp.bfloat16 if k.dtype == jnp.bfloat16 else jnp.float32
    qxT = qx.T.astype(cdtype)                                           # (H, Q)
    wk2 = wk_t.astype(cdtype)
    wp2 = wp_t.astype(cdtype)
    bk2 = bk.reshape(1, H).astype(jnp.float32)
    bp2 = bp.reshape(1, OUT).astype(jnp.float32)

    cap = _vmem_capacity_bytes()
    budget = max(8 << 20, (cap - (12 << 20)) // 3)

    if block_batch is None:
        BB, nb = _pick_block_batch(B, L, E, H, Q, OUT, budget)
    else:
        BB = int(min(B, max(1, block_batch)))
        if BB < B:
            BB = max(8, (BB // 8) * 8)
        nb = pl.cdiv(B, BB)

    B_pad = nb * BB
    k_in = k if B_pad == B else jnp.pad(k, ((0, B_pad - B), (0, 0), (0, 0)))
    k_flat = k_in.reshape(B_pad * L, E)                                 # HBM reshape: free

    # Per-step VMEM estimate: double-buffered k tile + resident weights/qx/biases
    # (counted once) + double-buffered output slabs + in-kernel f32 temporaries.
    est = (2 * BB * L * E * 4
           + (E * H + H * OUT + H * Q + H + OUT) * 4
           + 2 * BB * Q * (OUT + L) * 4
           + BB * L * (H + 4 * Q) * 4 + BB * Q * (H + L) * 4)
    vmem_limit = int(max(32 << 20, min(cap - (12 << 20), 2 * est)))
    vmem_limit = int(min(vmem_limit, cap - (8 << 20)))

    out_flat, score_flat = pl.pallas_call(
        _nqa_kernel,
        out_shape=(
            jax.ShapeDtypeStruct((B_pad * Q, OUT), k.dtype),
            jax.ShapeDtypeStruct((B_pad * Q, L), jnp.float32),
        ),
        grid_spec=pltpu.PrefetchScalarGridSpec(
            num_scalar_prefetch=0,
            grid=(nb,),
            in_specs=[
                pl.BlockSpec((BB * L, E), lambda b: (b, 0)),   # k slab, BB batches/step
                pl.BlockSpec((H, Q), lambda b: (0, 0)),        # qx^T (resident)
                pl.BlockSpec((E, H), lambda b: (0, 0)),        # Wk^T
                pl.BlockSpec((1, H), lambda b: (0, 0)),        # bk
                pl.BlockSpec((H, OUT), lambda b: (0, 0)),      # Wproj^T
                pl.BlockSpec((1, OUT), lambda b: (0, 0)),      # bproj
            ],
            out_specs=[
                pl.BlockSpec((BB * Q, OUT), lambda b: (b, 0)),
                pl.BlockSpec((BB * Q, L), lambda b: (b, 0)),
            ],
        ),
        compiler_params=pltpu.CompilerParams(
            dimension_semantics=("parallel",),
            vmem_limit_bytes=vmem_limit),
    )(k_flat, qxT, wk2, bk2, wp2, bp2)

    out = out_flat.reshape(B_pad, Q, OUT)[:B]
    score = score_flat.reshape(B_pad, Q, L)[:B]
    return out, score


def init_params(key, embed_dim, hidden_dim, out_dim, q_len):
    """Deterministic init matching the PyTorch module's parameter shapes."""
    ks = jax.random.split(key, 7)
    lin = lambda kk, fan_in, shape: jax.random.uniform(
        kk, shape, jnp.float32, -1.0 / math.sqrt(fan_in), 1.0 / math.sqrt(fan_in))
    wk = lin(ks[0], embed_dim, (hidden_dim, embed_dim))   # nn.Linear(E, H)
    bk = lin(ks[1], embed_dim, (hidden_dim,))
    wq = lin(ks[2], embed_dim, (hidden_dim, embed_dim))
    bq = lin(ks[3], embed_dim, (hidden_dim,))
    wp = lin(ks[4], hidden_dim, (out_dim, hidden_dim))    # nn.Linear(H, OUT)
    bp = lin(ks[5], hidden_dim, (out_dim,))
    qp = jax.random.uniform(ks[6], (q_len, embed_dim), jnp.float32,
                            -1.0 / math.sqrt(embed_dim), 1.0 / math.sqrt(embed_dim))
    return wk, bk, wq, bq, wp, bp, qp


def reference(k, qp, wk, bk, wq, bq, wp, bp):
    """Pure-JAX reference mirroring the PyTorch forward (n_head=1, dropout=0)."""
    hp = jax.lax.Precision.HIGHEST
    B = k.shape[0]
    q = jnp.broadcast_to(qp[None], (B,) + qp.shape)
    kx = jnp.einsum('ble,he->blh', k, wk, precision=hp) + bk
    qx = jnp.einsum('bqe,he->bqh', q, wq, precision=hp) + bq
    score = jax.nn.softmax(jnp.einsum('bqh,blh->bql', qx, kx, precision=hp), axis=-1)
    out = jnp.einsum('bql,blh->bqh', score, kx, precision=hp)
    out = jnp.einsum('bqh,oh->bqo', out, wp, precision=hp) + bp
    return out, score


def _run_case(key, B, L, E, H, OUT, QL, block_batch=None):
    kparam, kinput = jax.random.split(key)
    wk, bk, wq, bq, wp, bp, qp = init_params(kparam, E, H, OUT, QL)
    k = jax.random.normal(kinput, (B, L, E), jnp.float32)

    out, score = no_query_attention(k, qp, wk.T, bk, wq.T, bq, wp.T, bp,
                                    block_batch=block_batch)
    out = jax.block_until_ready(out)
    score = jax.block_until_ready(score)

    ref_out, ref_score = reference(k, qp, wk, bk, wq, bq, wp, bp)
    assert out.shape == (B, QL, OUT) and score.shape == (B, QL, L)
    assert jnp.allclose(out, ref_out, atol=1e-3, rtol=1e-3), \
        f"out mismatch: max err {jnp.max(jnp.abs(out - ref_out))}"
    assert jnp.allclose(score, ref_score, atol=1e-4, rtol=1e-3), \
        f"score mismatch: max err {jnp.max(jnp.abs(score - ref_score))}"


if __name__ == "__main__":
    key = jax.random.PRNGKey(0)
    k1, k2, k3 = jax.random.split(key, 3)

    # small shapes: batch=2, k_len=8, embed_dim=32 (n_head=1 -> hidden=out=32, q_len=1)
    _run_case(k1, B=2, L=8, E=32, H=32, OUT=32, QL=1)
    # larger single-step case
    _run_case(k2, B=10, L=32, E=64, H=64, OUT=64, QL=1)
    # multi-step grid + batch padding (B=20, 8 batches fused per step -> 3 steps)
    _run_case(k3, B=20, L=8, E=32, H=32, OUT=32, QL=1, block_batch=8)

    print("KERNEL_OK")
</pallas_src>

<mosaic_0001>
module attributes {stable_mosaic.version = 11 : i64} {
  func.func @_nqa_kernel(%arg0: i32, %arg1: memref<16x32xf32, #tpu.memory_space<vmem>>, %arg2: memref<32x1xf32, #tpu.memory_space<vmem>>, %arg3: memref<32x32xf32, #tpu.memory_space<vmem>>, %arg4: memref<1x32xf32, #tpu.memory_space<vmem>>, %arg5: memref<32x32xf32, #tpu.memory_space<vmem>>, %arg6: memref<1x32xf32, #tpu.memory_space<vmem>>, %arg7: memref<2x32xf32, #tpu.memory_space<vmem>>, %arg8: memref<2x8xf32, #tpu.memory_space<vmem>>) attributes {dimension_semantics = [#tpu.dimension_semantics<parallel>], iteration_bounds = array<i64: 1>, scalar_prefetch = 0 : i64, scratch_operands = 0 : i64, tpu.core_type = #tpu.core_type<tc>, window_params = [{transform_indices = @transform_0, window_bounds = array<i64: 16, 32>}, {pipeline_mode = #tpu.pipeline_mode<synchronous>, transform_indices = @transform_1, window_bounds = array<i64: 32, 1>}, {pipeline_mode = #tpu.pipeline_mode<synchronous>, transform_indices = @transform_2, window_bounds = array<i64: 32, 32>}, {pipeline_mode = #tpu.pipeline_mode<synchronous>, transform_indices = @transform_3, window_bounds = array<i64: 1, 32>}, {pipeline_mode = #tpu.pipeline_mode<synchronous>, transform_indices = @transform_4, window_bounds = array<i64: 32, 32>}, {pipeline_mode = #tpu.pipeline_mode<synchronous>, transform_indices = @transform_5, window_bounds = array<i64: 1, 32>}, {transform_indices = @transform_6, window_bounds = array<i64: 2, 32>}, {transform_indices = @transform_7, window_bounds = array<i64: 2, 8>}]} {
    %c0 = arith.constant 0 : index
    %c0_0 = arith.constant 0 : index
    %0 = vector.load %arg1[%c0, %c0_0] : memref<16x32xf32, #tpu.memory_space<vmem>>, vector<16x32xf32>
    %c0_1 = arith.constant 0 : index
    %c0_2 = arith.constant 0 : index
    %1 = vector.load %arg3[%c0_1, %c0_2] : memref<32x32xf32, #tpu.memory_space<vmem>>, vector<32x32xf32>
    %cst = arith.constant dense<0.000000e+00> : vector<16x32xf32>
    %2 = tpu.matmul %0, %1, %cst {dimension_numbers = #tpu.dot_dimension_numbers<[1], [0], [0], [1], [0, 0, 1, 1], [], []>} : vector<16x32xf32>, vector<32x32xf32>, vector<16x32xf32> -> vector<16x32xf32>
    %c0_3 = arith.constant 0 : index
    %c0_4 = arith.constant 0 : index
    %3 = vector.load %arg4[%c0_3, %c0_4] : memref<1x32xf32, #tpu.memory_space<vmem>>, vector<1x32xf32>
    %4 = vector.broadcast %3 : vector<1x32xf32> to vector<16x32xf32>
    %5 = arith.addf %2, %4 : vector<16x32xf32>
    %c0_5 = arith.constant 0 : index
    %c0_6 = arith.constant 0 : index
    %6 = vector.load %arg2[%c0_5, %c0_6] : memref<32x1xf32, #tpu.memory_space<vmem>>, vector<32x1xf32>
    %cst_7 = arith.constant dense<0.000000e+00> : vector<16x1xf32>
    %7 = tpu.matmul %5, %6, %cst_7 {dimension_numbers = #tpu.dot_dimension_numbers<[1], [0], [0], [1], [0, 0, 1, 1], [], []>} : vector<16x32xf32>, vector<32x1xf32>, vector<16x1xf32> -> vector<16x1xf32>
    %8 = vector.shape_cast %7 : vector<16x1xf32> to vector<2x8x1xf32>
    %cst_8 = arith.constant dense<0xFF800000> : vector<2x1xf32>
    %9 = vector.multi_reduction <maximumf>, %8, %cst_8 [1] : vector<2x8x1xf32> to vector<2x1xf32>
    %10 = vector.shape_cast %9 : vector<2x1xf32> to vector<2x1x1xf32>
    %11 = vector.broadcast %10 : vector<2x1x1xf32> to vector<2x8x1xf32>
    %12 = arith.subf %8, %11 : vector<2x8x1xf32>
    %13 = math.exp %12 : vector<2x8x1xf32>
    %cst_9 = arith.constant dense<0.000000e+00> : vector<2x1xf32>
    %14 = vector.multi_reduction <add>, %13, %cst_9 [1] : vector<2x8x1xf32> to vector<2x1xf32>
    %15 = vector.shape_cast %14 : vector<2x1xf32> to vector<2x1x1xf32>
    %16 = tpu.reciprocal %15 : vector<2x1x1xf32> -> vector<2x1x1xf32>
    %17 = vector.broadcast %16 : vector<2x1x1xf32> to vector<2x8x1xf32>
    %18 = arith.mulf %13, %17 : vector<2x8x1xf32>
    %19 = vector.shape_cast %5 : vector<16x32xf32> to vector<2x8x32xf32>
    %20 = vector.broadcast %18 : vector<2x8x1xf32> to vector<2x8x32xf32>
    %21 = arith.mulf %20, %19 : vector<2x8x32xf32>
    %cst_10 = arith.constant dense<0.000000e+00> : vector<2x32xf32>
    %22 = vector.multi_reduction <add>, %21, %cst_10 [1] : vector<2x8x32xf32> to vector<2x32xf32>
    %c0_11 = arith.constant 0 : index
    %c0_12 = arith.constant 0 : index
    %23 = vector.load %arg5[%c0_11, %c0_12] : memref<32x32xf32, #tpu.memory_space<vmem>>, vector<32x32xf32>
    %cst_13 = arith.constant dense<0.000000e+00> : vector<2x32xf32>
    %24 = tpu.matmul %22, %23, %cst_13 {dimension_numbers = #tpu.dot_dimension_numbers<[1], [0], [0], [1], [0, 0, 1, 1], [], []>} : vector<2x32xf32>, vector<32x32xf32>, vector<2x32xf32> -> vector<2x32xf32>
    %c0_14 = arith.constant 0 : index
    %c0_15 = arith.constant 0 : index
    %25 = vector.load %arg6[%c0_14, %c0_15] : memref<1x32xf32, #tpu.memory_space<vmem>>, vector<1x32xf32>
    %26 = vector.broadcast %25 : vector<1x32xf32> to vector<2x32xf32>
    %27 = arith.addf %24, %26 : vector<2x32xf32>
    %c0_16 = arith.constant 0 : index
    %c0_17 = arith.constant 0 : index
    %28 = vector.load %arg7[%c0_16, %c0_17] : memref<2x32xf32, #tpu.memory_space<vmem>>, vector<2x32xf32>
    tpu.vector_store %arg7[%c0_16, %c0_17], %27 {strides = array<i32>} : memref<2x32xf32, #tpu.memory_space<vmem>>, vector<2x32xf32>,
    %29 = tpu.transpose %18, [0, 2, 1] : vector<2x8x1xf32> -> vector<2x1x8xf32>
    %30 = vector.shape_cast %29 : vector<2x1x8xf32> to vector<2x8xf32>
    %c0_18 = arith.constant 0 : index
    %c0_19 = arith.constant 0 : index
    %31 = vector.load %arg8[%c0_18, %c0_19] : memref<2x8xf32, #tpu.memory_space<vmem>>, vector<2x8xf32>
    tpu.vector_store %arg8[%c0_18, %c0_19], %30 {strides = array<i32>} : memref<2x8xf32, #tpu.memory_space<vmem>>, vector<2x8xf32>,
    return
  }
  func.func @transform_0(%arg0: i32) -> (i32, i32) {
    %c0_i32 = arith.constant 0 : i32
    %c0_i32_0 = arith.constant 0 : i32
    return %arg0, %c0_i32 : i32, i32
  }
  func.func @transform_1(%arg0: i32) -> (i32, i32) {
    %c0_i32 = arith.constant 0 : i32
    %c0_i32_0 = arith.constant 0 : i32
    %c0_i32_1 = arith.constant 0 : i32
    return %c0_i32, %c0_i32_0 : i32, i32
  }
  func.func @transform_2(%arg0: i32) -> (i32, i32) {
    %c0_i32 = arith.constant 0 : i32
    %c0_i32_0 = arith.constant 0 : i32
    %c0_i32_1 = arith.constant 0 : i32
    return %c0_i32, %c0_i32_0 : i32, i32
  }
  func.func @transform_3(%arg0: i32) -> (i32, i32) {
    %c0_i32 = arith.constant 0 : i32
    %c0_i32_0 = arith.constant 0 : i32
    %c0_i32_1 = arith.constant 0 : i32
    return %c0_i32, %c0_i32_0 : i32, i32
  }
  func.func @transform_4(%arg0: i32) -> (i32, i32) {
    %c0_i32 = arith.constant 0 : i32
    %c0_i32_0 = arith.constant 0 : i32
    %c0_i32_1 = arith.constant 0 : i32
    return %c0_i32, %c0_i32_0 : i32, i32
  }
  func.func @transform_5(%arg0: i32) -> (i32, i32) {
    %c0_i32 = arith.constant 0 : i32
    %c0_i32_0 = arith.constant 0 : i32
    %c0_i32_1 = arith.constant 0 : i32
    return %c0_i32, %c0_i32_0 : i32, i32
  }
  func.func @transform_6(%arg0: i32) -> (i32, i32) {
    %c0_i32 = arith.constant 0 : i32
    %c0_i32_0 = arith.constant 0 : i32
    return %arg0, %c0_i32 : i32, i32
  }
  func.func @transform_7(%arg0: i32) -> (i32, i32) {
    %c0_i32 = arith.constant 0 : i32
    %c0_i32_0 = arith.constant 0 : i32
    return %arg0, %c0_i32 : i32, i32
  }
}

</mosaic_0001>

<bundles_post_ra>
// kernel: tpu_custom_call.1
= control target key start
LH: loop header
LB: loop body
LE: loop exit
PB: predicated region body
PF: predicated region fallthrough
CT: control target
= control target key end

     0   :  { %13 = vsyncpa [#allocation3], 0  ;;  %s831_s0 = inlined_call_operand.hbm [shape: f32[16,32], index: 0, kind: input, shape index: {}]   ;;  %s832_s1 = inlined_call_operand.vmem [shape: f32[32,1], index: 1, kind: input, shape index: {}]   ;;  %s833_s2 = inlined_call_operand.vmem [shape: f32[32,32], index: 2, kind: input, shape index: {}]   ;;  %s834_s3 = inlined_call_operand.vmem [shape: f32[1,32], index: 3, kind: input, shape index: {}]   ;;  %s835_s4 = inlined_call_operand.hbm [shape: f32[32,32], index: 4, kind: input, shape index: {}]   ;;  %s836_s5 = inlined_call_operand.vmem [shape: f32[1,32], index: 5, kind: input, shape index: {}]   ;;  %s837_s6 = inlined_call_operand.hbm [shape: f32[2,32], index: 6, kind: output, shape index: {0}]   ;;  %s838_s7 = inlined_call_operand.hbm [shape: f32[2,8], index: 7, kind: output, shape index: {1}]  }
   0x1   :  { %14 = vsyncpa [#allocation6], 0 }
   0x2   :  { %15 = vsyncpa [#allocation4], 0 }
   0x3   :  { %16 = vsyncpa [#allocation9], 0  ;;  %s684_s24 = smov [#allocation2]   ;;  %s588_s28 = scalar_lea.hbm %s831_s0, 256 }
   0x4   :  { %s22_s25 = sshll.u32 %s684_s24, 4  ;;  %p589_p0 = scmp.ne.s32.totalorder %s831_s0, %s588_s28  ;;  %s23_s25 = int_to_ptr.vmem [resolvable:$true] %s22_s25 }
   0x5   :  { %p592_p1 = scmp.lt.u32.totalorder %s588_s28, %s831_s0 }
   0x7   :  { %p594_p2 = pnand %p592_p1, %p589_p0 }
   0x9   :  { %597 = shalt.err (!%p594_p2)
}
   0xa   :  { %s598_s10 = scalar_lea.vmem %s23_s25, 256  ;;  %p603_p4 = scmp.lt.s32.totalorder %s23_s25, %s23_s25 }
   0xb   :  { %p599_p3 = scmp.ne.s32.totalorder %s23_s25, %s598_s10  ;;  %p604_p5 = scmp.lt.s32.totalorder %s598_s10, %s598_s10 }
   0xd   :  { %p605_p6 = por %p604_p5, %p603_p4 }
   0xf   :  { %p606_p7 = pnand %p605_p6, %p599_p3 }
  0x11   :  { %609 = shalt.err (!%p606_p7)
}
  0x12   :  { %s685_s11 = smov 128   ;;  %s686_s12 = smov 8  }
  0x13   :  { %28 = dma.hbm_to_vmem [thread:$0]  %s831_s0, 256, %s23_s25, [#allocation3], %s685_s11, %s685_s11, %s686_s12  }
  0x14   :  { %s687_s15 = smov [#allocation5]   ;;  %s610_s19 = scalar_lea.hbm %s835_s4, 512 }
  0x15   :  { %s40_s16 = sshll.u32 %s687_s15, 4  ;;  %p611_p8 = scmp.ne.s32.totalorder %s835_s4, %s610_s19  ;;  %s41_s16 = int_to_ptr.vmem [resolvable:$true] %s40_s16 }
  0x16   :  { %p614_p9 = scmp.lt.u32.totalorder %s610_s19, %s835_s4 }
  0x18   :  { %p616_p10 = pnand %p614_p9, %p611_p8 }
  0x1a   :  { %619 = shalt.err (!%p616_p10)
}
  0x1b   :  { %s620_s24 = scalar_lea.vmem %s41_s16, 512  ;;  %p625_p12 = scmp.lt.s32.totalorder %s41_s16, %s41_s16 }
  0x1c   :  { %p621_p11 = scmp.ne.s32.totalorder %s41_s16, %s620_s24  ;;  %p626_p13 = scmp.lt.s32.totalorder %s620_s24, %s620_s24 }
  0x1e   :  { %p627_p0 = por %p626_p13, %p625_p12 }
  0x20   :  { %p628_p1 = pnand %p627_p0, %p621_p11 }
  0x22   :  { %631 = shalt.err (!%p628_p1)
}
  0x23   :  { %46 = dma.hbm_to_vmem [thread:$0]  %s835_s4, 512, %s41_s16, [#allocation6], %s685_s11, %s685_s11, %s686_s12  }
  0x24   :  { %676 = dma.done.wait [#allocation3], 256  }
  0x25   :  { %677 = vsyncadd [#allocation3], 4294967040 }
  0x26   :  { %678 = dma.done.wait [#allocation6], 512  }
  0x27   :  { %679 = vsyncadd [#allocation6], 4294966784  ;;  %vm68_vm0 = vcmask 261120   ;;  %v57_v0 = vld [vmem:[%s833_s2] sm:$0xff]  ;;  %v58_v1 = vld [vmem:[%s833_s2 + $0x8] sm:$0xff]  ;;  %v688_v19 = vmov 0  }
  0x28   :  { %v59_v2 = vld [vmem:[%s833_s2 + $0x10] sm:$0xff]  ;;  %v547_v3 = vpack.c.bf16 %v58_v1, %v57_v0  ;;  %v60_v4 = vld [vmem:[%s833_s2 + $0x18] sm:$0xff]  ;;  %v55_v5 = vld [vmem:[#allocation2] sm:$0xff]  ;;  %579 = vset.pattern.permute.xlu0 %v688_v19  ;;  %vm235_vm1 = vcmask 7168   ;;  %v689_v63 = vmov 0.0|0.0   ;;  %vm690_vm2 = vmmov 0  }
  0x29   :  { %v551_v6 = vpack.c.bf16 %v60_v4, %v59_v2  ;;  %522 = vmatprep.mubr.msk.f32.mxu0 %vm68_vm0, %v55_v5  ;;  %v150_v7 = vld [vmem:[%s832_s1] sm:$0xff]  ;;  %v151_v8 = vld [vmem:[%s832_s1 + $0x8] sm:$0xff]  ;;  %v152_v11 = vld [vmem:[%s832_s1 + $0x10] sm:$0xff]  ;;  %vm313_vm3 = vcmask 1041409   ;;  %vm458_vm4 = vcmask 58368  }
  0x2a   :  { %548 = vmatprep.subr.bf16.mxu0 %v547_v3  ;;  %v555_v9 = vpack.c.bf16 %v151_v8, %v150_v7  ;;  %v56_v10 = vld [vmem:[#allocation2 + $0x8] sm:$0xff]  ;;  %v153_v12 = vld [vmem:[%s832_s1 + $0x18] sm:$0xff]  ;;  %v490_v14 = vld [vmem:[%s834_s3] ss:$0 sm:$0xff]  ;;  %s692_s1 = smov [#allocation8]  }
  0x2b   :  { %550 = vmatpush3.bf16.msra.mxu0 %v547_v3  ;;  %v559_v13 = vpack.c.bf16 %v153_v12, %v152_v11  ;;  %v300_v60 = vld [vmem:[#allocation5] sm:$0xff]  ;;  %v301_v61 = vld [vmem:[#allocation5 + $0x8] sm:$0xff]  ;;  %v302_v0 = vld [vmem:[#allocation5 + $0x10] sm:$0xff]  ;;  %v691_v3 = vmov 0.0   ;;  %s476_s3 = sshll.u32 %s692_s1, 4  ;;  %s477_s3 = int_to_ptr.vmem [resolvable:$true] %s476_s3 }
  0x2c   :  { %552 = vmatprep.subr.bf16.mxu0 %v551_v6  ;;  %556 = vmatprep.subr.bf16.mxu1 %v555_v9  ;;  %v564_v62 = vpack.c.bf16 %v301_v61, %v300_v60  ;;  %v303_v1 = vld [vmem:[#allocation5 + $0x18] sm:$0xff]  ;;  %s632_s19 = scalar_lea.vmem %s477_s3, 32  ;;  %p637_p3 = scmp.lt.s32.totalorder %s477_s3, %s477_s3 }
  0x2d   :  { %558 = vmatpush3.bf16.msra.mxu1 %v555_v9  ;;  %v567_v2 = vpack.c.bf16 %v303_v1, %v302_v0  ;;  %p633_p2 = scmp.ne.s32.totalorder %s477_s3, %s632_s19  ;;  %p638_p4 = scmp.lt.s32.totalorder %s632_s19, %s632_s19 }
  0x2e   :  { %560 = vmatprep.subr.bf16.mxu1 %v559_v13 }
  0x2f   :  { %554 = vmatpush3.bf16.msra.mxu0 %v551_v6  ;;  %p639_p5 = por %p638_p4, %p637_p3 }
  0x30   :  { %563 = vmatprep.subr.bf16.mxu0 %v689_v63 }
  0x31   :  { %562 = vmatpush3.bf16.msra.mxu1 %v559_v13  ;;  %p640_p6 = pnand %p639_p5, %p633_p2 }
  0x32   :  { %523 = vmatmul.mubr.msk.f32.vlgmr.msra.gmra.mrb[0].mxu0 %vm68_vm0, %v56_v10 }
  0x33   :  { %565 = vmatpush3.bf16.msra.mxu0 %v564_v62  ;;  %544 = vmatprep.mubr.msk.f32.mxu0 %vm690_vm2, %v691_v3 }
  0x34   :  { %566 = vmatprep.subr.bf16.mxu0 %v689_v63 }
  0x37   :  { %568 = vmatpush3.bf16.msra.mxu0 %v567_v2 }
 0x105   :  { %v524_v15 = vpop.f32.mrb[0].mxu0 }
 0x106   :  { %v141_v16 = vpop.f32.mrb[1].mxu0  ;;  %v789_v18 = vadd.f32 %v524_v15, %v490_v14 }
 0x107   :  { %v787_v17 = vadd.f32 %v490_v14, %v141_v16 }
 0x109   :  { %533 = vmatprep.mubr.msk.f32.mxu1 %vm68_vm0, %v787_v17 }
 0x10a   :  { %534 = vmatmul.mubr.msk.f32.vlgmr.msra.gmra.mrb[0].mxu1 %vm68_vm0, %v789_v18 }
 0x1dd   :  { %v535_v20 = vpop.f32.mrb[0].mxu1 }
 0x1de   :  { %v243_v21 = vsel %vm235_vm1, %v535_v20, -inf  ;;  %v226_v22 = vpop.f32.mrb[1].mxu1 }
 0x1df   :  { %v244_v23 = vrot.slane %v243_v21, 4  ;;  %v236_v24 = vsel %vm235_vm1, %v226_v22, -inf }
 0x1e0   :  { %v237_v25 = vrot.slane %v236_v24, 4 }
 0x1e1   :  { %v245_v26 = vmax.f32 %v243_v21, %v244_v23 }
 0x1e2   :  { %v238_v27 = vmax.f32 %v236_v24, %v237_v25 }
 0x1e3   :  { %v246_v28 = vrot.slane %v245_v26, 2 }
 0x1e4   :  { %v239_v29 = vrot.slane %v238_v27, 2 }
 0x1e5   :  { %v247_v30 = vmax.f32 %v245_v26, %v246_v28 }
 0x1e6   :  { %v240_v31 = vmax.f32 %v238_v27, %v239_v29 }
 0x1e7   :  { %v248_v32 = vrot.slane %v247_v30, 1 }
 0x1e8   :  { %v241_v33 = vrot.slane %v240_v31, 1 }
 0x1e9   :  { %v249_v34 = vmax.f32 %v247_v30, %v248_v32 }
 0x1ea   :  { %v242_v35 = vmax.f32 %v240_v31, %v241_v33 }
 0x1eb   :  { %v251_v36 = vsub.f32 %v535_v20, %v249_v34 }
 0x1ec   :  { %v250_v37 = vsub.f32 %v226_v22, %v242_v35 }
 0x1ed   :  { %v254_v38 = vmul.f32 1.442695, %v251_v36 }
 0x1ee   :  { %v252_v39 = vmul.f32 1.442695, %v250_v37 }
 0x1ef   :  { %580 = vpow2.f32 %v254_v38 }
 0x1f0   :  { %582 = vpow2.f32 %v252_v39 }
 0x1f9   :  { %v581_v40 = vpop.eup %580 }
 0x1fa   :  { %v583_v41 = vpop.eup %582  ;;  %v263_v42 = vsel %vm235_vm1, %v581_v40, 0.0 }
 0x1fb   :  { %v264_v43 = vrot.slane %v263_v42, 4  ;;  %v256_v44 = vsel %vm235_vm1, %v583_v41, 0.0 }
 0x1fc   :  { %v257_v45 = vrot.slane %v256_v44, 4 }
 0x1fd   :  { %v265_v46 = vadd.f32 %v264_v43, %v263_v42 }
 0x1fe   :  { %v258_v47 = vadd.f32 %v257_v45, %v256_v44 }
 0x1ff   :  { %v266_v48 = vrot.slane %v265_v46, 2 }
 0x200   :  { %v259_v49 = vrot.slane %v258_v47, 2 }
 0x201   :  { %v267_v50 = vadd.f32 %v266_v48, %v265_v46 }
 0x202   :  { %v260_v51 = vadd.f32 %v259_v49, %v258_v47 }
 0x203   :  { %v268_v52 = vrot.slane %v267_v50, 1 }
 0x204   :  { %v261_v53 = vrot.slane %v260_v51, 1 }
 0x205   :  { %v269_v54 = vadd.f32 %v268_v52, %v267_v50 }
 0x206   :  { %v262_v55 = vadd.f32 %v261_v53, %v260_v51 }
 0x207   :  { %584 = vrcp.f32 %v269_v54 }
 0x208   :  { %586 = vrcp.f32 %v262_v55 }
 0x211   :  { %v585_v56 = vpop.eup %584 }
 0x212   :  { %v587_v57 = vpop.eup %586  ;;  %v273_v58 = vmul.f32 %v585_v56, %v581_v40 }
 0x213   :  { %v272_v59 = vmul.f32 %v587_v57, %v583_v41 }
 0x214   :  { %421 = vxpose.xlu1.b32.start.end [1/1] (short) (narrow) %v273_v58, 8 }
 0x215   :  { %276 = vperm.xlu0 %579, %v272_v59  }
 0x218   :  { %389 = vxpose.xlu1.b32.start.end [1/1] (short) (narrow) %v272_v59, 8 }
 0x219   :  { %281 = vperm.xlu0 %579, %v273_v58  }
 0x294   :  { %v277_v4 = vpop.permute.xlu0 %276  ;;  %v437_v24 = vpop.trf.xlu1 }
 0x295   :  { %v284_v5 = vmul.f32 %v277_v4, %v787_v17  ;;  %v455_v25 = vrot.slane %v437_v24, 7 }
 0x297   :  { %v286_v6 = vsel %vm68_vm0, %v284_v5, 0.0 }
 0x298   :  { %v287_v7 = vrot.slane %v286_v6, 4  ;;  %v282_v8 = vpop.permute.xlu0 %281 }
 0x299   :  { %v285_v9 = vmul.f32 %v282_v8, %v789_v18  ;;  %v405_v18 = vpop.trf.xlu1 }
 0x29a   :  { %v288_v10 = vadd.f32 %v287_v7, %v286_v6  ;;  %v456_v26 = vsel %vm313_vm3, %v455_v25, %v405_v18 }
 0x29b   :  { %v293_v11 = vsel %vm68_vm0, %v285_v9, 0.0  ;;  %459 = vst.msk [vmem:[#allocation8] sm:$0x3] %vm458_vm4, %v456_v26 }
 0x29c   :  { %v289_v12 = vrot.slane %v288_v10, 2  ;;  %v294_v13 = vrot.slane %v293_v11, 4 }
 0x29e   :  { %v290_v14 = vadd.f32 %v289_v12, %v288_v10  ;;  %v295_v15 = vadd.f32 %v294_v13, %v293_v11 }
 0x2a0   :  { %v296_v16 = vrot.slane %v295_v15, 2  ;;  %v291_v19 = vrot.slane %v290_v14, 1 }
 0x2a2   :  { %v297_v20 = vadd.f32 %v296_v16, %v295_v15  ;;  %v292_v22 = vadd.f32 %v291_v19, %v290_v14 }
 0x2a4   :  { %v298_v21 = vrot.slane %v297_v20, 1 }
 0x2a6   :  { %v299_v17 = vadd.f32 %v298_v21, %v297_v20 }
 0x2a8   :  { %v314_v23 = vsel %vm313_vm3, %v299_v17, %v292_v22 }
 0x2a9   :  { %545 = vmatmul.mubr.msk.f32.vlgmr.msra.gmra.mrb[2].mxu0 %vm68_vm0, %v314_v23 }
 0x2aa   :  { %643 = shalt.err (!%p640_p6)
}
 0x2ab   :  { %s644_s22 = scalar_lea.hbm %s838_s7, 32 }
 0x2ac   :  { %p645_p7 = scmp.ne.s32.totalorder %s838_s7, %s644_s22  ;;  %p648_p8 = scmp.lt.u32.totalorder %s644_s22, %s838_s7 }
 0x2ae   :  { %p650_p9 = pnand %p648_p8, %p645_p7 }
 0x2b0   :  { %653 = shalt.err (!%p650_p9)
}
 0x2b1   :  { %479 = dma.vmem_to_hbm [thread:$0]  %s477_s3, 32, %s838_s7, [#allocation9]   ;;  %v495_v27 = vld [vmem:[%s836_s5] ss:$0 sm:$0xff]  ;;  %vm387_vm5 = vcmask 254976  }
 0x2b2   :  { %s693_s30 = smov [#allocation7]  }
 0x2b3   :  { %s466_s8 = sshll.u32 %s693_s30, 4  ;;  %s467_s8 = int_to_ptr.vmem [resolvable:$true] %s466_s8 }
 0x2b4   :  { %s654_s9 = scalar_lea.vmem %s467_s8, 32  ;;  %p659_p11 = scmp.lt.s32.totalorder %s467_s8, %s467_s8 }
 0x2b5   :  { %p655_p10 = scmp.ne.s32.totalorder %s467_s8, %s654_s9  ;;  %p660_p12 = scmp.lt.s32.totalorder %s654_s9, %s654_s9 }
 0x2b7   :  { %p661_p13 = por %p660_p12, %p659_p11 }
 0x2b9   :  { %p662_p0 = pnand %p661_p13, %p655_p10 }
 0x37c   :  { %v383_v28 = vpop.f32.mrb[2].mxu0 }
 0x37d   :  { %v384_v29 = vadd.f32 %v495_v27, %v383_v28  ;;  %v546_v30 = vpop.f32.mrb[3].mxu0 }
 0x37f   :  { %388 = vst.msk [vmem:[#allocation7] sm:$0x3] %vm387_vm5, %v384_v29 }
 0x380   :  { %665 = shalt.err (!%p662_p0)
}
 0x381   :  { %s666_s10 = scalar_lea.hbm %s837_s6, 32 }
 0x382   :  { %p667_p1 = scmp.ne.s32.totalorder %s837_s6, %s666_s10  ;;  %p670_p2 = scmp.lt.u32.totalorder %s666_s10, %s837_s6 }
 0x384   :  { %p672_p3 = pnand %p670_p2, %p667_p1 }
 0x386   :  { %675 = shalt.err (!%p672_p3)
}
 0x387   :  { %469 = dma.vmem_to_hbm [thread:$0]  %s467_s8, 32, %s837_s6, [#allocation4]  }
 0x388   :  { %680 = dma.done.wait [#allocation4], 32  }
 0x389   :  { %681 = vsyncadd [#allocation4], 4294967264 }
 0x38a   :  { %682 = dma.done.wait [#allocation9], 32  }
 0x38b   :  { %683 = vsyncadd [#allocation9], 4294967264 }
 0x38c   :  { %486 = vsyncpa [#allocation3], 1 }
 0x38d   :  { %487 = vsyncpa [#allocation6], 1 }
 0x38e   :  { %488 = vsyncpa [#allocation4], 1 }
 0x38f   :  { %489 = vsyncpa [#allocation9], 1 }

</bundles_post_ra>
